<compile_context>
chip_gen: v5e
topology: v5e:2x2
jax: 0.10.0
libtpu: 0.0.40
codegen_flags: <defaults>
</compile_context>

<pallas_src>
import functools

import jax
import jax.numpy as jnp
from jax import lax
from jax.experimental import pallas as pl
from jax.experimental.pallas import tpu as pltpu


def _round_up(x, m):
    return (x + m - 1) // m * m


def _dmi_mat_kernel(logits_ref, tgt_ref, mat_ref, *, n, num_classes, tile_n,
                    tiles_per_split):
    """Accumulate one lane-dense batch tile into the (C, C) confusion matrix.

    logits_ref: (C, TN)  logits tile — classes on sublanes, samples on lanes.
    tgt_ref:    (1, TN)  int32 targets tile (lane-dense).
    mat_ref:    (C, C)   f32 resident output block; mat_ref[c2, c1] holds
                         sum_n [target[n] == c1] * softmax(logits)[n, c2],
                         i.e. the transpose of the reference `mat`.  det is
                         transpose-invariant; the wrapper re-transposes anyway.
    """
    s = pl.program_id(0)   # parallel split
    i = pl.program_id(1)   # batch-tile reduction step within the split

    @pl.when(i == 0)
    def _init():
        mat_ref[...] = jnp.zeros_like(mat_ref)

    # Numerically-stable softmax over the class (sublane) axis, in f32
    # regardless of the input dtype (bf16 inputs are widened here, in VMEM).
    x = logits_ref[...].astype(jnp.float32)                  # (C, TN)
    m = jnp.max(x, axis=0, keepdims=True)                    # (1, TN)
    e = jnp.exp(x - m)                                       # (C, TN)
    denom = jnp.sum(e, axis=0, keepdims=True)                # (1, TN)
    # EUP approximate reciprocal + one Newton step: EUP-slot offload while
    # keeping f32 accuracy (the determinant amplifies per-element error).
    inv = pl.reciprocal(denom, approx=True)
    inv = inv * (2.0 - denom * inv)
    p = e * inv                                              # (C, TN)

    # In-kernel tail masking: lanes at or beyond the true batch length n
    # (ragged boundary tile and wrapper lane padding) contribute nothing.
    tgt = tgt_ref[...]                                       # (1, TN)
    start = (s * tiles_per_split + i) * tile_n
    pos = start + lax.broadcasted_iota(jnp.int32, (1, tile_n), 1)
    valid = pos < n                                          # (1, TN)

    # mat^T[:, c1] += sum over lanes of p masked to samples of class c1.
    # C masked VPU selects + lane reductions; no MXU, no operand transpose.
    # TODO(synk): for very large C (hundreds+), tile the class loop instead of
    # materializing C full-width masks per batch tile.
    cols = []
    for cls in range(num_classes):
        msk = jnp.logical_and(valid, tgt == cls)             # (1, TN)
        cols.append(jnp.sum(jnp.where(msk, p, 0.0), axis=1, keepdims=True))
    mat_ref[...] += jnp.concatenate(cols, axis=1)            # (C, C)


def dmi_loss(output, target, num_classes, *, tile_n=131072, num_splits=1):
    """Pallas-backed DMI loss. output: (N, C) logits, target: (N,) class ids.

    num_splits: set to 2 on v7x (two TensorCores per chip); keep 1 on v5e/v6e
    where a split only adds an extra partial-mat block and init/sum overhead.
    """
    n, c = output.shape
    assert c == num_classes
    assert tile_n % 128 == 0  # lane tiles must be multiples of 128

    # Lane-dense layout plumbing: one fused XLA pass producing a (C, lanes)
    # slab with lanes = round_up(n, 128).  Original dtype preserved (the cast
    # to f32 happens inside the kernel, saving HBM traffic for bf16 inputs).
    lanes = _round_up(max(n, 1), 128)
    tn = min(tile_n, lanes)
    n_tiles = pl.cdiv(lanes, tn)

    splits = max(1, num_splits)
    if n_tiles % splits != 0:
        splits = 1  # fall back rather than emitting fully out-of-bounds tiles
    tiles_per_split = n_tiles // splits

    logits_t = jnp.pad(output.T, ((0, 0), (0, lanes - n)))
    tgt_row = jnp.pad(target.astype(jnp.int32).reshape(1, n),
                      ((0, 0), (0, lanes - n)), constant_values=-1)

    kernel = functools.partial(
        _dmi_mat_kernel, n=n, num_classes=num_classes, tile_n=tn,
        tiles_per_split=tiles_per_split)

    # Double-buffered logits + target tiles (sublane-padded to 8 rows in VMEM).
    sub_c = _round_up(max(c, 8), 8)
    vmem_bytes = 2 * tn * (sub_c * output.dtype.itemsize + 8 * 4) + (2 << 20)
    vmem_bytes = min(max(vmem_bytes, 16 * 1024 * 1024), 64 * 1024 * 1024)

    partial_mats = pl.pallas_call(
        kernel,
        out_shape=jax.ShapeDtypeStruct((splits, c, c), jnp.float32),
        grid_spec=pltpu.PrefetchScalarGridSpec(
            num_scalar_prefetch=0,
            grid=(splits, tiles_per_split),
            in_specs=[
                pl.BlockSpec((c, tn),
                             lambda s, i: (0, s * tiles_per_split + i)),
                pl.BlockSpec((1, tn),
                             lambda s, i: (0, s * tiles_per_split + i)),
            ],
            # Leading dim squeezed: kernel sees a (C, C) accumulator-resident
            # output block, one per parallel split.
            out_specs=pl.BlockSpec((None, c, c), lambda s, i: (s, 0, 0)),
        ),
        compiler_params=pltpu.CompilerParams(
            dimension_semantics=("parallel", "arbitrary"),
            vmem_limit_bytes=vmem_bytes,
        ),
    )(logits_t, tgt_row)

    # Combine per-split partials; un-transpose to match the reference mat.
    mat = jnp.sum(partial_mats, axis=0).T

    # TODO(synk): the CxC determinant has no Pallas primitive; it is computed
    # with jnp.linalg.det outside the kernel (negligible: C is tiny).
    det = jnp.linalg.det(mat)
    return -1.0 * jnp.log(jnp.abs(det) + 0.001)


def dmi_loss_reference(output, target, num_classes):
    """Pure-JAX reference of the PyTorch forward for sanity checking."""
    p = jax.nn.softmax(output.astype(jnp.float32), axis=1)
    y_onehot = jax.nn.one_hot(target, num_classes, dtype=jnp.float32)  # (N, C)
    mat = y_onehot.T @ p
    return -1.0 * jnp.log(jnp.abs(jnp.linalg.det(mat)) + 0.001)


if __name__ == "__main__":
    num_classes = 4
    key = jax.random.PRNGKey(0)
    k1, k2, k3, k4 = jax.random.split(key, 4)

    # Case 1: small batch at the scale the module implies (single tile path).
    logits_s = jax.random.normal(k1, (8, num_classes), dtype=jnp.float32)
    target_s = jax.random.randint(k2, (8,), 0, num_classes, dtype=jnp.int32)
    loss_s = jax.block_until_ready(dmi_loss(logits_s, target_s, num_classes))
    ref_s = jax.block_until_ready(
        dmi_loss_reference(logits_s, target_s, num_classes))
    assert jnp.allclose(loss_s, ref_s, atol=1e-4, rtol=1e-4), (loss_s, ref_s)

    # Case 2: ragged batch exercising the multi-tile masked path and the
    # 2-way parallel split (one partial (C, C) mat per split).
    logits_l = jax.random.normal(k3, (1000, num_classes), dtype=jnp.float32)
    target_l = jax.random.randint(k4, (1000,), 0, num_classes, dtype=jnp.int32)
    loss_l = jax.block_until_ready(
        dmi_loss(logits_l, target_l, num_classes, tile_n=256, num_splits=2))
    ref_l = jax.block_until_ready(
        dmi_loss_reference(logits_l, target_l, num_classes))
    assert jnp.allclose(loss_l, ref_l, atol=1e-4, rtol=1e-4), (loss_l, ref_l)

    print("KERNEL_OK")
</pallas_src>

<mosaic_0001>
module attributes {stable_mosaic.version = 11 : i64} {
  func.func @_dmi_mat_kernel(%arg0: i32, %arg1: i32, %arg2: memref<4x128xf32, #tpu.memory_space<vmem>>, %arg3: memref<1x128xi32, #tpu.memory_space<vmem>>, %arg4: memref<1x4x4xf32, #tpu.memory_space<vmem>>) attributes {dimension_semantics = [#tpu.dimension_semantics<parallel>, #tpu.dimension_semantics<arbitrary>], iteration_bounds = array<i64: 1, 1>, scalar_prefetch = 0 : i64, scratch_operands = 0 : i64, tpu.core_type = #tpu.core_type<tc>, window_params = [{transform_indices = @transform_0, window_bounds = array<i64: 4, 128>}, {transform_indices = @transform_1, window_bounds = array<i64: 1, 128>}, {transform_indices = @transform_2, window_bounds = array<i64: 1, 4, 4>}]} {
    %c0_i32 = arith.constant 0 : i32
    %0 = arith.cmpi eq, %arg1, %c0_i32 : i32
    %1 = arith.extui %0 : i1 to i32
    %c0_i32_0 = arith.constant 0 : i32
    %2 = arith.cmpi ne, %1, %c0_i32_0 : i32
    scf.if %2 {
      %cst_22 = arith.constant 0.000000e+00 : f32
      %70 = vector.broadcast %cst_22 : f32 to vector<4x4xf32>
      %c0_23 = arith.constant 0 : index
      %c0_24 = arith.constant 0 : index
      %c0_25 = arith.constant 0 : index
      %71 = vector.load %arg4[%c0_23, %c0_24, %c0_25] : memref<1x4x4xf32, #tpu.memory_space<vmem>>, vector<1x4x4xf32>
      %72 = vector.shape_cast %71 : vector<1x4x4xf32> to vector<4x4xf32>
      %73 = vector.shape_cast %70 : vector<4x4xf32> to vector<1x4x4xf32>
      tpu.vector_store %arg4[%c0_23, %c0_24, %c0_25], %73 {strides = array<i32>} : memref<1x4x4xf32, #tpu.memory_space<vmem>>, vector<1x4x4xf32>,
    } else {
    }
    %c0 = arith.constant 0 : index
    %c0_1 = arith.constant 0 : index
    %3 = vector.load %arg2[%c0, %c0_1] : memref<4x128xf32, #tpu.memory_space<vmem>>, vector<4x128xf32>
    %cst = arith.constant dense<0xFF800000> : vector<128xf32>
    %4 = vector.multi_reduction <maximumf>, %3, %cst [0] : vector<4x128xf32> to vector<128xf32>
    %5 = vector.shape_cast %4 : vector<128xf32> to vector<1x128xf32>
    %6 = vector.broadcast %5 : vector<1x128xf32> to vector<4x128xf32>
    %7 = arith.subf %3, %6 : vector<4x128xf32>
    %8 = math.exp %7 : vector<4x128xf32>
    %cst_2 = arith.constant dense<0.000000e+00> : vector<128xf32>
    %9 = vector.multi_reduction <add>, %8, %cst_2 [0] : vector<4x128xf32> to vector<128xf32>
    %10 = vector.shape_cast %9 : vector<128xf32> to vector<1x128xf32>
    %11 = tpu.reciprocal %10 {approx = true} : vector<1x128xf32> -> vector<1x128xf32>
    %12 = arith.mulf %10, %11 : vector<1x128xf32>
    %cst_3 = arith.constant 2.000000e+00 : f32
    %13 = vector.broadcast %cst_3 : f32 to vector<1x128xf32>
    %14 = arith.subf %13, %12 : vector<1x128xf32>
    %15 = arith.mulf %11, %14 : vector<1x128xf32>
    %16 = vector.broadcast %15 : vector<1x128xf32> to vector<4x128xf32>
    %17 = arith.mulf %8, %16 : vector<4x128xf32>
    %c0_4 = arith.constant 0 : index
    %c0_5 = arith.constant 0 : index
    %18 = vector.load %arg3[%c0_4, %c0_5] : memref<1x128xi32, #tpu.memory_space<vmem>>, vector<1x128xi32>
    %c1_i32 = arith.constant 1 : i32
    %19 = arith.muli %arg0, %c1_i32 : i32
    %20 = arith.addi %19, %arg1 : i32
    %c128_i32 = arith.constant 128 : i32
    %21 = arith.muli %20, %c128_i32 : i32
    %22 = tpu.iota {dimensions = array<i32: 1>} : vector<1x128xi32>
    %23 = vector.broadcast %21 : i32 to vector<1x128xi32>
    %24 = arith.addi %23, %22 : vector<1x128xi32>
    %c8_i32 = arith.constant 8 : i32
    %25 = vector.broadcast %c8_i32 : i32 to vector<1x128xi32>
    %26 = arith.cmpi slt, %24, %25 : vector<1x128xi32>
    %c0_i32_6 = arith.constant 0 : i32
    %27 = vector.broadcast %c0_i32_6 : i32 to vector<1x128xi32>
    %28 = arith.cmpi eq, %18, %27 : vector<1x128xi32>
    %29 = arith.andi %26, %28 : vector<1x128xi1>
    %cst_7 = arith.constant 0.000000e+00 : f32
    %30 = vector.shape_cast %29 : vector<1x128xi1> to vector<1x128xi1>
    %31 = vector.broadcast %30 : vector<1x128xi1> to vector<4x128xi1>
    %32 = vector.broadcast %cst_7 : f32 to vector<4x128xf32>
    %33 = arith.select %31, %17, %32 : vector<4x128xi1>, vector<4x128xf32>
    %cst_8 = arith.constant dense<0.000000e+00> : vector<4xf32>
    %34 = vector.multi_reduction <add>, %33, %cst_8 [1] : vector<4x128xf32> to vector<4xf32>
    %35 = vector.shape_cast %34 : vector<4xf32> to vector<4x1xf32>
    %c1_i32_9 = arith.constant 1 : i32
    %36 = vector.broadcast %c1_i32_9 : i32 to vector<1x128xi32>
    %37 = arith.cmpi eq, %18, %36 : vector<1x128xi32>
    %38 = arith.andi %26, %37 : vector<1x128xi1>
    %cst_10 = arith.constant 0.000000e+00 : f32
    %39 = vector.shape_cast %38 : vector<1x128xi1> to vector<1x128xi1>
    %40 = vector.broadcast %39 : vector<1x128xi1> to vector<4x128xi1>
    %41 = vector.broadcast %cst_10 : f32 to vector<4x128xf32>
    %42 = arith.select %40, %17, %41 : vector<4x128xi1>, vector<4x128xf32>
    %cst_11 = arith.constant dense<0.000000e+00> : vector<4xf32>
    %43 = vector.multi_reduction <add>, %42, %cst_11 [1] : vector<4x128xf32> to vector<4xf32>
    %44 = vector.shape_cast %43 : vector<4xf32> to vector<4x1xf32>
    %c2_i32 = arith.constant 2 : i32
    %45 = vector.broadcast %c2_i32 : i32 to vector<1x128xi32>
    %46 = arith.cmpi eq, %18, %45 : vector<1x128xi32>
    %47 = arith.andi %26, %46 : vector<1x128xi1>
    %cst_12 = arith.constant 0.000000e+00 : f32
    %48 = vector.shape_cast %47 : vector<1x128xi1> to vector<1x128xi1>
    %49 = vector.broadcast %48 : vector<1x128xi1> to vector<4x128xi1>
    %50 = vector.broadcast %cst_12 : f32 to vector<4x128xf32>
    %51 = arith.select %49, %17, %50 : vector<4x128xi1>, vector<4x128xf32>
    %cst_13 = arith.constant dense<0.000000e+00> : vector<4xf32>
    %52 = vector.multi_reduction <add>, %51, %cst_13 [1] : vector<4x128xf32> to vector<4xf32>
    %53 = vector.shape_cast %52 : vector<4xf32> to vector<4x1xf32>
    %c3_i32 = arith.constant 3 : i32
    %54 = vector.broadcast %c3_i32 : i32 to vector<1x128xi32>
    %55 = arith.cmpi eq, %18, %54 : vector<1x128xi32>
    %56 = arith.andi %26, %55 : vector<1x128xi1>
    %cst_14 = arith.constant 0.000000e+00 : f32
    %57 = vector.shape_cast %56 : vector<1x128xi1> to vector<1x128xi1>
    %58 = vector.broadcast %57 : vector<1x128xi1> to vector<4x128xi1>
    %59 = vector.broadcast %cst_14 : f32 to vector<4x128xf32>
    %60 = arith.select %58, %17, %59 : vector<4x128xi1>, vector<4x128xf32>
    %cst_15 = arith.constant dense<0.000000e+00> : vector<4xf32>
    %61 = vector.multi_reduction <add>, %60, %cst_15 [1] : vector<4x128xf32> to vector<4xf32>
    %62 = vector.shape_cast %61 : vector<4xf32> to vector<4x1xf32>
    %c0_16 = arith.constant 0 : index
    %c0_17 = arith.constant 0 : index
    %c0_18 = arith.constant 0 : index
    %63 = vector.load %arg4[%c0_16, %c0_17, %c0_18] : memref<1x4x4xf32, #tpu.memory_space<vmem>>, vector<1x4x4xf32>
    %64 = vector.shape_cast %63 : vector<1x4x4xf32> to vector<4x4xf32>
    %65 = tpu.concatenate %35, %44, %53, %62 in 1 : vector<4x1xf32>, vector<4x1xf32>, vector<4x1xf32>, vector<4x1xf32> -> vector<4x4xf32>
    %66 = arith.addf %64, %65 : vector<4x4xf32>
    %c0_19 = arith.constant 0 : index
    %c0_20 = arith.constant 0 : index
    %c0_21 = arith.constant 0 : index
    %67 = vector.load %arg4[%c0_19, %c0_20, %c0_21] : memref<1x4x4xf32, #tpu.memory_space<vmem>>, vector<1x4x4xf32>
    %68 = vector.shape_cast %67 : vector<1x4x4xf32> to vector<4x4xf32>
    %69 = vector.shape_cast %66 : vector<4x4xf32> to vector<1x4x4xf32>
    tpu.vector_store %arg4[%c0_19, %c0_20, %c0_21], %69 {strides = array<i32>} : memref<1x4x4xf32, #tpu.memory_space<vmem>>, vector<1x4x4xf32>,
    return
  }
  func.func @transform_0(%arg0: i32, %arg1: i32) -> (i32, i32) {
    %c1_i32 = arith.constant 1 : i32
    %0 = arith.muli %arg0, %c1_i32 : i32
    %1 = arith.addi %0, %arg1 : i32
    %c0_i32 = arith.constant 0 : i32
    %c0_i32_0 = arith.constant 0 : i32
    return %c0_i32, %1 : i32, i32
  }
  func.func @transform_1(%arg0: i32, %arg1: i32) -> (i32, i32) {
    %c1_i32 = arith.constant 1 : i32
    %0 = arith.muli %arg0, %c1_i32 : i32
    %1 = arith.addi %0, %arg1 : i32
    %c0_i32 = arith.constant 0 : i32
    %c0_i32_0 = arith.constant 0 : i32
    return %c0_i32, %1 : i32, i32
  }
  func.func @transform_2(%arg0: i32, %arg1: i32) -> (i32, i32, i32) {
    %c0_i32 = arith.constant 0 : i32
    %c0_i32_0 = arith.constant 0 : i32
    %c0_i32_1 = arith.constant 0 : i32
    return %arg0, %c0_i32, %c0_i32_0 : i32, i32, i32
  }
}

</mosaic_0001>

<bundles_post_ra>
// kernel: tpu_custom_call.1
= control target key start
LH: loop header
LB: loop body
LE: loop exit
PB: predicated region body
PF: predicated region fallthrough
CT: control target
= control target key end

     0   :  { %7 = vsyncpa [#allocation3], 0  ;;  %s273_s0 = inlined_call_operand.hbm [shape: f32[4,128], index: 0, kind: input, shape index: {}]   ;;  %s274_s1 = inlined_call_operand.hbm [shape: s32[1,128], index: 1, kind: input, shape index: {}]   ;;  %s275_s2 = inlined_call_operand.hbm [shape: f32[1,4,4], index: 2, kind: output, shape index: {}]  }
   0x1   :  { %8 = vsyncpa [#allocation6], 0 }
   0x2   :  { %9 = vsyncpa [#allocation4], 0  ;;  %s18_s11 = sshll.u32 %s273_s0, 4  ;;  %s236_s12 = smov [#allocation2]   ;;  %s19_s11 = int_to_ptr.hbm [resolvable:$true] %s18_s11 }
   0x3   :  { %s20_s13 = sshll.u32 %s236_s12, 4  ;;  %s31_s16 = sshll.u32 %s274_s1, 4  ;;  %s21_s13 = int_to_ptr.vmem [resolvable:$true] %s20_s13  ;;  %s32_s16 = int_to_ptr.hbm [resolvable:$true] %s31_s16 }
   0x4   :  { %23 = dma.hbm_to_vmem [thread:$0]  %s19_s11, 64, %s21_s13, [#allocation3]  }
   0x5   :  { %s237_s17 = smov [#allocation5]  }
   0x6   :  { %s33_s18 = sshll.u32 %s237_s17, 4  ;;  %s34_s18 = int_to_ptr.vmem [resolvable:$true] %s33_s18 }
   0x7   :  { %36 = dma.hbm_to_vmem [thread:$0]  %s32_s16, 16, %s34_s18, [#allocation6]  }
   0x8   :  { %230 = dma.done.wait [#allocation3], 64  }
   0x9   :  { %231 = vsyncadd [#allocation3], 4294967232 }
   0xa   :  { %232 = dma.done.wait [#allocation6], 16  }
   0xb   :  { %233 = vsyncadd [#allocation6], 4294967280  ;;  %vm51_vm0 = vcmask 27648   ;;  %v238_v0 = vmov 0.0   ;;  %vm54_vm1 = vcmask 1043456   ;;  %v80_v15 = vlaneseq  ;;  %s240_s0 = smov [#allocation7]  }
   0xc   :  { %52 = vst.msk [vmem:[#allocation7] sm:$0xf] %vm51_vm0, %v238_v0  ;;  %v53_v1 = vld [vmem:[#allocation2] sm:$0xf]  ;;  %v77_v19 = vld [vmem:[#allocation5] sm:$0x1] }
   0xd   :  { %v55_v2 = vsel %vm54_vm1, %v53_v1, -inf  ;;  %v81_v18 = vand.u32 127, %v80_v15  ;;  %vm85_vm3 = vcmp.eq.s32.totalorder %v77_v19, 0  ;;  %vm103_vm4 = vcmp.eq.s32.totalorder %v77_v19, 2  ;;  %s136_s1 = sshll.u32 %s240_s0, 4  ;;  %s138_s21 = sshll.u32 %s275_s2, 4  ;;  %s137_s1 = int_to_ptr.vmem [resolvable:$true] %s136_s1  ;;  %s139_s21 = int_to_ptr.hbm [resolvable:$true] %s138_s21 }
   0xe   :  { %v56_v3 = vrot.slane %v55_v2, 4  ;;  %vm94_vm7 = vcmp.eq.s32.totalorder %v77_v19, 1  ;;  %vm112_vm8 = vcmp.eq.s32.totalorder %v77_v19, 3  ;;  %v239_v22 = vmov 0  }
   0xf   :  { %vm84_vm2 = vcmp.lt.s32.totalorder %v81_v18, 8  ;;  %vm122_vm15 = vcmask 7168  }
  0x10   :  { %v57_v4 = vmax.f32 %v55_v2, %v56_v3  ;;  %vm86_vm5 = vmand %vm84_vm2, %vm85_vm3  ;;  %vm126_vm3 = vcmask 23552  }
  0x11   :  { %vm104_vm6 = vmand %vm84_vm2, %vm103_vm4  ;;  %v87_v23 = vsel %vm86_vm5, 1, %v239_v22 }
  0x12   :  { %v58_v5 = vrot.slane %v57_v4, 2  ;;  %v105_v24 = vsel %vm104_vm6, 1, %v239_v22  ;;  %vm95_vm9 = vmand %vm84_vm2, %vm94_vm7  ;;  %v88_v27 = vperm.slane %v87_v23, 0 }
  0x13   :  { %vm113_vm10 = vmand %vm84_vm2, %vm112_vm8  ;;  %v106_v28 = vperm.slane %v105_v24, 0  ;;  %v96_v30 = vsel %vm95_vm9, 1, %v239_v22  ;;  %vm124_vm2 = vcmask 15360   ;;  %v121_v49 = vld [vmem:[#allocation7] sm:$0xf] }
  0x14   :  { %v59_v6 = vmax.f32 %v57_v4, %v58_v5  ;;  %v114_v31 = vsel %vm113_vm10, 1, %v239_v22  ;;  %vm89_vm11 = vcmp.eq.s32.totalorder %v88_v27, 1  ;;  %v97_v33 = vperm.slane %v96_v30, 0 }
  0x15   :  { %vm107_vm12 = vcmp.eq.s32.totalorder %v106_v28, 1  ;;  %v115_v34 = vperm.slane %v114_v31, 0 }
  0x16   :  { %v60_v7 = vrot.slane %v59_v6, 1  ;;  %vm98_vm13 = vcmp.eq.s32.totalorder %v97_v33, 1 }
  0x17   :  { %vm116_vm14 = vcmp.eq.s32.totalorder %v115_v34, 1 }
  0x18   :  { %v61_v8 = vmax.f32 %v59_v6, %v60_v7 }
  0x1a   :  { %v62_v9 = vsub.f32 %v53_v1, %v61_v8 }
  0x1c   :  { %v63_v10 = vmul.f32 1.442695, %v62_v9 }
  0x1e   :  { %154 = vpow2.f32 %v63_v10 }
  0x24   :  { %v155_v11 = vpop.eup %154 }
  0x25   :  { %v65_v12 = vsel %vm54_vm1, %v155_v11, 0.0 }
  0x26   :  { %v66_v13 = vrot.slane %v65_v12, 4 }
  0x28   :  { %v67_v14 = vadd.f32 %v66_v13, %v65_v12 }
  0x2a   :  { %v68_v16 = vrot.slane %v67_v14, 2 }
  0x2c   :  { %v69_v17 = vadd.f32 %v68_v16, %v67_v14 }
  0x2e   :  { %v70_v20 = vrot.slane %v69_v17, 1 }
  0x30   :  { %v71_v21 = vadd.f32 %v70_v20, %v69_v17 }
  0x32   :  { %156 = vrcp.f32 %v71_v21 }
  0x38   :  { %v157_v25 = vpop.eup %156 }
  0x39   :  { %v73_v26 = vmul.f32 %v157_v25, %v71_v21 }
  0x3b   :  { %v74_v29 = vsub.f32 2.0, %v73_v26 }
  0x3d   :  { %v75_v32 = vmul.f32 %v157_v25, %v74_v29 }
  0x3f   :  { %v76_v35 = vmul.f32 %v155_v11, %v75_v32 }
  0x41   :  { %v90_v36 = vsel %vm89_vm11, %v76_v35, 0.0  ;;  %v108_v37 = vsel %vm107_vm12, %v76_v35, 0.0  ;;  %v99_v40 = vsel %vm98_vm13, %v76_v35, 0.0  ;;  %v117_v41 = vsel %vm116_vm14, %v76_v35, 0.0 }
  0x42   :  { %v91_v38 = vsel %vm54_vm1, %v90_v36, 0.0  ;;  %v109_v39 = vsel %vm54_vm1, %v108_v37, 0.0  ;;  %v100_v42 = vsel %vm54_vm1, %v99_v40, 0.0  ;;  %v118_v43 = vsel %vm54_vm1, %v117_v41, 0.0 }
  0x43   :  { %92 = vadd.xlane.f32.xlu0 %v91_v38  ;;  %110 = vadd.xlane.f32.xlu1 %v109_v39 }
  0x4b   :  { %101 = vadd.xlane.f32.xlu0 %v100_v42  ;;  %119 = vadd.xlane.f32.xlu1 %v118_v43 }
  0xb6   :  { %v93_v44 = vpop.xlane.xlu0 %92  ;;  %v111_v45 = vpop.xlane.xlu1 %110 }
  0xbe   :  { %v102_v46 = vpop.xlane.xlu0 %101  ;;  %v120_v47 = vpop.xlane.xlu1 %119 }
  0xbf   :  { %v123_v48 = vsel %vm122_vm15, %v93_v44, %v102_v46 }
  0xc0   :  { %v125_v50 = vsel %vm124_vm2, %v123_v48, %v111_v45 }
  0xc1   :  { %v127_v51 = vsel %vm126_vm3, %v125_v50, %v120_v47 }
  0xc2   :  { %v128_v52 = vadd.f32 %v127_v51, %v121_v49 }
  0xc4   :  { %130 = vst.msk [vmem:[#allocation7] sm:$0xf] %vm51_vm0, %v128_v52 }
  0xc5   :  { %141 = dma.vmem_to_hbm [thread:$0]  %s137_s1, 64, %s139_s21, [#allocation4]  }
  0xc6   :  { %234 = dma.done.wait [#allocation4], 64  }
  0xc7   :  { %235 = vsyncadd [#allocation4], 4294967232 }
  0xc8   :  { %146 = vsyncpa [#allocation3], 1 }
  0xc9   :  { %147 = vsyncpa [#allocation6], 1 }
  0xca   :  { %148 = vsyncpa [#allocation4], 1 }

</bundles_post_ra>
